<compile_context>
chip_gen: v7x
topology: tpu7x:2x2x1
jax: 0.10.0
libtpu: 0.0.40
codegen_flags: <defaults>
</compile_context>

<pallas_src>
import functools

import jax
import jax.numpy as jnp
from jax import lax
from jax.experimental import pallas as pl
from jax.experimental.pallas import tpu as pltpu


def _round_up(n, m):
    return ((n + m - 1) // m) * m


# ---------------------------------------------------------------------------
# Pass 1: fused per-batch bias  c[b] = bias - W @ max_s(x[b])
# ---------------------------------------------------------------------------
def _fused_bias_kernel(x_ref, w_ref, b_ref, c_ref, max_acc,
                       *, set_size, set_tile, needs_mask):
    si = pl.program_id(1)

    @pl.when(si == 0)
    def _():
        max_acc[...] = jnp.full(max_acc.shape, jnp.finfo(jnp.float32).min,
                                jnp.float32)

    xt = x_ref[0]                                   # (C_in_p, TS)
    if needs_mask:
        # mask padded / out-of-bounds set columns so zero padding (or garbage
        # in a ragged last block) never corrupts the row max
        col = si * set_tile + lax.broadcasted_iota(jnp.int32, xt.shape, 1)
        xt = jnp.where(col < set_size, xt, jnp.finfo(jnp.float32).min)

    max_acc[...] = jnp.maximum(max_acc[...],
                               jnp.max(xt, axis=1, keepdims=True))

    @pl.when(si == pl.num_programs(1) - 1)
    def _():
        c = b_ref[...] - jnp.dot(w_ref[...], max_acc[...],
                                 preferred_element_type=jnp.float32)
        c_ref[0] = c.astype(c_ref.dtype)


# ---------------------------------------------------------------------------
# Pass 2: out[b, :, tile] = W @ x[b, :, tile] + c[b]
# ---------------------------------------------------------------------------
def _matmul_bias_kernel(x_ref, w_ref, c_ref, o_ref, *, use_bf16):
    xt = x_ref[0]                                   # (C_in_p, TS)
    w = w_ref[...]                                  # (C_out_p, C_in_p)
    if use_bf16:
        # bf16 MXU inputs, f32 accumulation (only worthwhile at large C_in/out)
        xt = xt.astype(jnp.bfloat16)
        w = w.astype(jnp.bfloat16)
    out = jnp.dot(w, xt, preferred_element_type=jnp.float32)
    out = out + c_ref[0]                            # (C_out_p, 1) broadcasts
    o_ref[0] = out.astype(o_ref.dtype)


def permute_invariant_layer(x, w, b, *, use_bf16_matmul=False, set_tile=None):
    """x: (B, C_in, S), w: (C_out, C_in), b: (C_out,) -> (B, C_out, S)."""
    B, C_in, S = x.shape
    C_out = w.shape[0]

    x = x.astype(jnp.float32)
    w = w.astype(jnp.float32)
    b = b.astype(jnp.float32)

    # --- pad to hardware-friendly shapes (zero padding is exact: padded W
    #     rows/cols are zero; padded S columns are masked in the max pass and
    #     sliced off the output) ---
    c_in_p = _round_up(C_in, 8)          # f32 sublane multiple
    c_out_p = _round_up(C_out, 8)
    s_p = _round_up(S, 128)              # lane-dense blocks / unmasked stores

    x_p = jnp.pad(x, ((0, 0), (0, c_in_p - C_in), (0, s_p - S)))
    w_p = jnp.pad(w, ((0, c_out_p - C_out), (0, c_in_p - C_in)))
    b_p = jnp.pad(b, (0, c_out_p - C_out)).reshape(c_out_p, 1)

    # --- S tile: largest 128-multiple whose double-buffered x + out tiles fit
    #     a conservative budget (safe for v7x 64 MiB VMEM) ---
    tile_budget = 24 * 1024 * 1024
    bytes_per_col = 2 * (c_in_p + c_out_p) * 4       # dbl-buffered x+out, f32
    ts = (tile_budget // bytes_per_col) // 128 * 128
    ts = max(128, min(s_p, ts))
    if set_tile is not None:                          # test/tuning override
        ts = max(128, min(s_p, _round_up(set_tile, 128)))
    n_s = pl.cdiv(s_p, ts)

    needs_mask = (s_p != S) or (s_p % ts != 0)

    # explicit VMEM budget sized from the actual double-buffered footprint
    needed = (2 * (c_in_p + c_out_p) * ts * 4         # x / out tiles
              + 2 * c_out_p * c_in_p * 4              # W
              + 2 * c_out_p * 4                       # bias / fused bias
              + 2 * c_in_p * 4)                       # max scratch
    vmem_limit = int(min(48 * 1024 * 1024,
                         max(16 * 1024 * 1024, needed + 4 * 1024 * 1024)))

    # ---- pass 1: fused bias c[b] = bias - W @ max_s(x[b]) ----
    fused_bias = pl.pallas_call(
        functools.partial(_fused_bias_kernel, set_size=S, set_tile=ts,
                          needs_mask=needs_mask),
        out_shape=jax.ShapeDtypeStruct((B, c_out_p, 1), jnp.float32),
        grid_spec=pltpu.PrefetchScalarGridSpec(
            num_scalar_prefetch=0,
            grid=(B, n_s),
            in_specs=[
                pl.BlockSpec((1, c_in_p, ts), lambda bi, si: (bi, 0, si)),
                pl.BlockSpec((c_out_p, c_in_p), lambda bi, si: (0, 0)),
                pl.BlockSpec((c_out_p, 1), lambda bi, si: (0, 0)),
            ],
            out_specs=pl.BlockSpec((1, c_out_p, 1), lambda bi, si: (bi, 0, 0)),
            scratch_shapes=[pltpu.VMEM((c_in_p, 1), jnp.float32)],
        ),
        compiler_params=pltpu.CompilerParams(
            dimension_semantics=("parallel", "arbitrary"),
            vmem_limit_bytes=vmem_limit,
        ),
    )(x_p, w_p, b_p)

    # ---- pass 2: S-tiled matmul + fused bias ----
    out_p = pl.pallas_call(
        functools.partial(_matmul_bias_kernel, use_bf16=use_bf16_matmul),
        out_shape=jax.ShapeDtypeStruct((B, c_out_p, s_p), jnp.float32),
        grid_spec=pltpu.PrefetchScalarGridSpec(
            num_scalar_prefetch=0,
            grid=(B, n_s),
            in_specs=[
                pl.BlockSpec((1, c_in_p, ts), lambda bi, si: (bi, 0, si)),
                pl.BlockSpec((c_out_p, c_in_p), lambda bi, si: (0, 0)),
                pl.BlockSpec((1, c_out_p, 1), lambda bi, si: (bi, 0, 0)),
            ],
            out_specs=pl.BlockSpec((1, c_out_p, ts),
                                   lambda bi, si: (bi, 0, si)),
        ),
        compiler_params=pltpu.CompilerParams(
            dimension_semantics=("parallel", "parallel"),
            vmem_limit_bytes=vmem_limit,
        ),
    )(x_p, w_p, fused_bias)

    return out_p[:, :C_out, :S]


def _reference(x, w, b):
    # pure-JAX reference mirroring the PyTorch forward
    maxv = jnp.max(x, axis=2, keepdims=True)
    return jnp.einsum("oi,bis->bos", w, x - maxv) + b[None, :, None]


if __name__ == "__main__":
    key = jax.random.PRNGKey(0)
    k_x, k_w, k_b = jax.random.split(key, 3)

    B, in_feat, out_feat, setsize = 2, 4, 8, 16

    x = jax.random.normal(k_x, (B, in_feat, setsize), dtype=jnp.float32)
    # PyTorch default Conv1d init: U(-1/sqrt(in_feat), 1/sqrt(in_feat))
    bound = 1.0 / (in_feat ** 0.5)
    w = jax.random.uniform(k_w, (out_feat, in_feat), jnp.float32, -bound, bound)
    b = jax.random.uniform(k_b, (out_feat,), jnp.float32, -bound, bound)

    # 1) primary check: non-aligned C_in (4) and S (16) exercise padding
    out = jax.block_until_ready(permute_invariant_layer(x, w, b))
    ref = _reference(x, w, b)
    assert out.shape == (B, out_feat, setsize)
    assert jnp.allclose(out, ref, atol=1e-5, rtol=1e-5)

    # 2) all-negative rows: catches zero-padding leaking into the row max
    x_neg = x - 5.0
    out_neg = jax.block_until_ready(permute_invariant_layer(x_neg, w, b))
    assert jnp.allclose(out_neg, _reference(x_neg, w, b), atol=1e-5, rtol=1e-5)

    # 3) multi-tile S with a ragged last tile (S=300, tile=256 -> 2 tiles)
    x2 = jax.random.normal(k_x, (B, in_feat, 300), dtype=jnp.float32) - 1.0
    out2 = jax.block_until_ready(
        permute_invariant_layer(x2, w, b, set_tile=256))
    assert out2.shape == (B, out_feat, 300)
    assert jnp.allclose(out2, _reference(x2, w, b), atol=1e-5, rtol=1e-5)

    # 4) optional bf16 MXU inputs (f32 accumulation), looser tolerance
    out_bf = jax.block_until_ready(
        permute_invariant_layer(x, w, b, use_bf16_matmul=True))
    assert jnp.allclose(out_bf, ref, atol=5e-2, rtol=5e-2)

    print("KERNEL_OK")
</pallas_src>

<mosaic_0001>
module attributes {stable_mosaic.version = 11 : i64} {
  func.func @_fused_bias_kernel(%arg0: i32, %arg1: i32, %arg2: memref<1x8x128xf32, #tpu.memory_space<vmem>>, %arg3: memref<8x8xf32, #tpu.memory_space<vmem>>, %arg4: memref<8x1xf32, #tpu.memory_space<vmem>>, %arg5: memref<1x8x1xf32, #tpu.memory_space<vmem>>, %arg6: memref<8x1xf32, #tpu.memory_space<vmem>>) attributes {dimension_semantics = [#tpu.dimension_semantics<parallel>, #tpu.dimension_semantics<arbitrary>], iteration_bounds = array<i64: 2, 1>, scalar_prefetch = 0 : i64, scratch_operands = 1 : i64, tpu.core_type = #tpu.core_type<tc>, window_params = [{transform_indices = @transform_0, window_bounds = array<i64: 1, 8, 128>}, {pipeline_mode = #tpu.pipeline_mode<synchronous>, transform_indices = @transform_1, window_bounds = array<i64: 8, 8>}, {pipeline_mode = #tpu.pipeline_mode<synchronous>, transform_indices = @transform_2, window_bounds = array<i64: 8, 1>}, {transform_indices = @transform_3, window_bounds = array<i64: 1, 8, 1>}]} {
    %c0_i32 = arith.constant 0 : i32
    %0 = arith.cmpi eq, %arg1, %c0_i32 : i32
    %1 = arith.extui %0 : i1 to i32
    %c0_i32_0 = arith.constant 0 : i32
    %2 = arith.cmpi ne, %1, %c0_i32_0 : i32
    scf.if %2 {
      %cst_10 = arith.constant -3.40282347E+38 : f32
      %21 = vector.broadcast %cst_10 : f32 to vector<8x1xf32>
      %c0_11 = arith.constant 0 : index
      %c0_12 = arith.constant 0 : index
      %22 = vector.load %arg6[%c0_11, %c0_12] : memref<8x1xf32, #tpu.memory_space<vmem>>, vector<8x1xf32>
      tpu.vector_store %arg6[%c0_11, %c0_12], %21 {strides = array<i32>} : memref<8x1xf32, #tpu.memory_space<vmem>>, vector<8x1xf32>,
    } else {
    }
    %c0 = arith.constant 0 : index
    %c0_1 = arith.constant 0 : index
    %c0_2 = arith.constant 0 : index
    %3 = vector.load %arg2[%c0, %c0_1, %c0_2] : memref<1x8x128xf32, #tpu.memory_space<vmem>>, vector<1x8x128xf32>
    %4 = vector.shape_cast %3 : vector<1x8x128xf32> to vector<8x128xf32>
    %c128_i32 = arith.constant 128 : i32
    %5 = arith.muli %arg1, %c128_i32 : i32
    %6 = tpu.iota {dimensions = array<i32: 1>} : vector<8x128xi32>
    %7 = vector.broadcast %5 : i32 to vector<8x128xi32>
    %8 = arith.addi %7, %6 : vector<8x128xi32>
    %c16_i32 = arith.constant 16 : i32
    %9 = vector.broadcast %c16_i32 : i32 to vector<8x128xi32>
    %10 = arith.cmpi slt, %8, %9 : vector<8x128xi32>
    %cst = arith.constant -3.40282347E+38 : f32
    %11 = vector.broadcast %cst : f32 to vector<8x128xf32>
    %12 = arith.select %10, %4, %11 : vector<8x128xi1>, vector<8x128xf32>
    %c0_3 = arith.constant 0 : index
    %c0_4 = arith.constant 0 : index
    %13 = vector.load %arg6[%c0_3, %c0_4] : memref<8x1xf32, #tpu.memory_space<vmem>>, vector<8x1xf32>
    %cst_5 = arith.constant dense<0xFF800000> : vector<8xf32>
    %14 = vector.multi_reduction <maximumf>, %12, %cst_5 [1] : vector<8x128xf32> to vector<8xf32>
    %15 = vector.shape_cast %14 : vector<8xf32> to vector<8x1xf32>
    %16 = arith.maximumf %13, %15 : vector<8x1xf32>
    %c0_6 = arith.constant 0 : index
    %c0_7 = arith.constant 0 : index
    %17 = vector.load %arg6[%c0_6, %c0_7] : memref<8x1xf32, #tpu.memory_space<vmem>>, vector<8x1xf32>
    tpu.vector_store %arg6[%c0_6, %c0_7], %16 {strides = array<i32>} : memref<8x1xf32, #tpu.memory_space<vmem>>, vector<8x1xf32>,
    %c0_i32_8 = arith.constant 0 : i32
    %18 = arith.cmpi eq, %arg1, %c0_i32_8 : i32
    %19 = arith.extui %18 : i1 to i32
    %c0_i32_9 = arith.constant 0 : i32
    %20 = arith.cmpi ne, %19, %c0_i32_9 : i32
    scf.if %20 {
      %c0_10 = arith.constant 0 : index
      %c0_11 = arith.constant 0 : index
      %21 = vector.load %arg4[%c0_10, %c0_11] : memref<8x1xf32, #tpu.memory_space<vmem>>, vector<8x1xf32>
      %c0_12 = arith.constant 0 : index
      %c0_13 = arith.constant 0 : index
      %22 = vector.load %arg3[%c0_12, %c0_13] : memref<8x8xf32, #tpu.memory_space<vmem>>, vector<8x8xf32>
      %c0_14 = arith.constant 0 : index
      %c0_15 = arith.constant 0 : index
      %23 = vector.load %arg6[%c0_14, %c0_15] : memref<8x1xf32, #tpu.memory_space<vmem>>, vector<8x1xf32>
      %cst_16 = arith.constant dense<0.000000e+00> : vector<8x1xf32>
      %24 = tpu.matmul %22, %23, %cst_16 {dimension_numbers = #tpu.dot_dimension_numbers<[1], [0], [0], [1], [0, 0, 1, 1], [], []>} : vector<8x8xf32>, vector<8x1xf32>, vector<8x1xf32> -> vector<8x1xf32>
      %25 = arith.subf %21, %24 : vector<8x1xf32>
      %c0_17 = arith.constant 0 : index
      %c0_18 = arith.constant 0 : index
      %c0_19 = arith.constant 0 : index
      %26 = vector.load %arg5[%c0_17, %c0_18, %c0_19] : memref<1x8x1xf32, #tpu.memory_space<vmem>>, vector<1x8x1xf32>
      %27 = vector.shape_cast %26 : vector<1x8x1xf32> to vector<8x1xf32>
      %28 = vector.shape_cast %25 : vector<8x1xf32> to vector<1x8x1xf32>
      tpu.vector_store %arg5[%c0_17, %c0_18, %c0_19], %28 {strides = array<i32>} : memref<1x8x1xf32, #tpu.memory_space<vmem>>, vector<1x8x1xf32>,
    } else {
    }
    return
  }
  func.func @transform_0(%arg0: i32, %arg1: i32) -> (i32, i32, i32) {
    %c0_i32 = arith.constant 0 : i32
    %c0_i32_0 = arith.constant 0 : i32
    return %arg0, %c0_i32, %arg1 : i32, i32, i32
  }
  func.func @transform_1(%arg0: i32, %arg1: i32) -> (i32, i32) {
    %c0_i32 = arith.constant 0 : i32
    %c0_i32_0 = arith.constant 0 : i32
    %c0_i32_1 = arith.constant 0 : i32
    return %c0_i32, %c0_i32_0 : i32, i32
  }
  func.func @transform_2(%arg0: i32, %arg1: i32) -> (i32, i32) {
    %c0_i32 = arith.constant 0 : i32
    %c0_i32_0 = arith.constant 0 : i32
    %c0_i32_1 = arith.constant 0 : i32
    return %c0_i32, %c0_i32_0 : i32, i32
  }
  func.func @transform_3(%arg0: i32, %arg1: i32) -> (i32, i32, i32) {
    %c0_i32 = arith.constant 0 : i32
    %c0_i32_0 = arith.constant 0 : i32
    %c0_i32_1 = arith.constant 0 : i32
    return %arg0, %c0_i32, %c0_i32_0 : i32, i32, i32
  }
}

</mosaic_0001>

<bundles_post_ra>
// kernel: tpu_custom_call.1
= control target key start
LH: loop header
LB: loop body
LE: loop exit
PB: predicated region body
PF: predicated region fallthrough
CT: control target
= control target key end

     0   :  { %8 = vsyncpa [#allocation4], 0  ;;  %s694_s0 = inlined_call_operand.hbm [shape: f32[2,8,128], index: 0, kind: input, shape index: {}]   ;;  %s695_s1 = inlined_call_operand.vmem [shape: f32[8,8], index: 1, kind: input, shape index: {}]   ;;  %s696_s2 = inlined_call_operand.vmem [shape: f32[8,1], index: 2, kind: input, shape index: {}]   ;;  %s697_s3 = inlined_call_operand.vmem [shape: f32[2,8,1], index: 3, kind: output, shape index: {}]  }
   0x1   :  { %10 = vsyncpa [#allocation4 + $0x1], 0  ;;  %s560_s12 = smov 0   ;;  %s562_s13 = smov 0  }
   0x2   :  { %s564_s14 = smov 0   ;;  %s566_s15 = smov 0  }
   0x3   :  { %s568_s16 = smov 0   ;;  %s570_s17 = smov 0  }
   0x4 LB: > { %s377_s18 = sadd.s32 4294967295, %s534_s17   ;;  %s28_s19 = sadd.s32 1, %s530_s16  ;;  %s534_s17 = sphi %s570_s17, %s16_s17   ;;  %s530_s16 = sphi %s568_s16, %s707_s16   ;;  %s526_s15 = sphi %s566_s15, %s706_s15   ;;  %s522_s14 = sphi %s564_s14, %s705_s14   ;;  %s518_s13 = sphi %s562_s13, %s704_s13   ;;  %s514_s12 = sphi %s560_s12, %s703_s12  }
   0x5   : > { %p30_p0 = scmp.ge.s32.totalorder %s28_s19, 2  ;;  %s37_s20 = sadd.s32 1, %s522_s14 }
   0x6   : > { %p44_p1 = scmp.ne.s32.totalorder %s522_s14, %s518_s13  ;;  %p45_p2 = scmp.eq.s32.totalorder %s534_s17, 0 }
   0x7   : > { %s709_s19 = smov (%p30_p0, %s28_s19), 0  ;;  %p50_p4 = scmp.ne.s32.totalorder %s518_s13, %s514_s12 }
   0x8   : > { %p596_p3 = por %p45_p2, %p44_p1  ;;  %s32_s22 = ssub.s32 %s530_s16, %s709_s19 }
   0x9   : > { %p51_p5 = scmp.eq.s32.totalorder %s377_s18, 0  ;;  %p35_p6 = scmp.eq.s32.totalorder %s32_s22, 0 }
   0xa   : > { %p402_p8 = scmp.lt.s32.totalorder %s534_s17, 2  ;;  %s148_s25 = sand.u32 1, %s522_s14  }
   0xb   : > { %p603_p7 = por %p51_p5, %p50_p4  ;;  %s382_s26 = sshll.u32 %s530_s16, 7 }
   0xc   : > { %s609_s24 = scalar_select %p35_p6, %s522_s14, %s37_s20  }
   0xd   : > { %s381_s27 = sshll.u32 %s148_s25, 3  ;;  %s616_s30 = scalar_lea.hbm %s694_s0, %s382_s26 }
   0xe   : > { %s152_s4 = scalar_lea.vmem [#allocation3], %s381_s27  ;;  %p620_p9 = pnand %p402_p8, %p596_p3 }
   0xf   : > { %s160_s5 = sshll.u32 %s152_s4, 4  ;;  %s149_s7 = scalar_lea.sflag [#allocation4], %s148_s25  ;;  %s624_s5 = int_to_ptr.vmem [resolvable:$true] %s160_s5 }
  0x10   : > { %s454_s8 = scalar_lea.hbm %s616_s30, 128  ;;  %p456_p13 = pneg %p620_p9 }
  0x11   : > { %p455_p12 = scmp.ne.s32.totalorder %s616_s30, %s454_s8  ;;  %s459_s11 = scalar_lea.hbm %s694_s0, 256 }
  0x12   : > { %p460_p2 = scmp.lt.u32.totalorder %s616_s30, %s694_s0  ;;  %p461_p3 = scmp.lt.u32.totalorder %s459_s11, %s454_s8 }
  0x13   : > { %p457_p0 = pnand %p456_p13, %p455_p12  ;;  %p463_p5 = scmp.lt.u32.totalorder %s454_s8, %s616_s30 }
  0x14   : > { %p462_p4 = por %p461_p3, %p460_p2 }
  0x15   : > { %p458_p1 = pneg %p457_p0 }
  0x16   : > { %p464_p6 = por %p463_p5, %p462_p4 }
  0x18   : > { %p465_p8 = pnand %p464_p6, %p458_p1 }
  0x1a   : > { %468 = shalt.err (!%p465_p8)
}
  0x1b   : > { %s469_s20 = scalar_lea.vmem %s624_s5, 128  ;;  %s536_s21 = smov [#allocation3]  }
  0x1c   : > { %p470_p12 = scmp.ne.s32.totalorder %s624_s5, %s469_s20  ;;  %s474_s22 = sshll.u32 %s536_s21, 4  ;;  %s475_s22 = int_to_ptr.vmem [resolvable:$false] %s474_s22 }
  0x1d   : > { %s476_s25 = scalar_lea.vmem %s475_s22, 256  ;;  %p477_p11 = scmp.lt.s32.totalorder %s624_s5, %s475_s22 }
  0x1e   : > { %p472_p0 = pnand %p470_p12, %p456_p13  ;;  %p478_p2 = scmp.lt.s32.totalorder %s476_s25, %s469_s20 }
  0x20   : > { %p473_p10 = pneg %p472_p0  ;;  %p479_p3 = por %p478_p2, %p477_p11 }
  0x22   : > { %p480_p4 = pnand %p479_p3, %p473_p10 }
  0x24   : > { %483 = shalt.err (!%p480_p4)
}
  0x25   : > { %401 = dma.hbm_to_vmem [thread:$0]  (!%p620_p9), %s616_s30, 128, %s624_s5, %s149_s7  }
  0x26   : > { %p701_p1 = scmp.lt.s32.totalorder %s534_s17, 3  ;;  %p702_p5 = scmp.ge.s32.totalorder %s534_s17, 1 }
  0x28   : > { %p166_p13 = pnand %p702_p5, %p701_p1 }
  0x29   : > { %s171_s26 = sand.u32 (!%p166_p13), 1, %s518_s13  }
  0x2a   : > { %169 = sbr.rel (%p166_p13) target bundleno = 424 (0x1a8), region = 32  ;;  %s384_s27 = sshll.u32 (!%p166_p13), %s171_s26, 3 }
  0x2b   : > { %s172_s28 = scalar_lea.sflag (!%p166_p13), [#allocation4], %s171_s26  ;;  %s175_s29 = scalar_lea.vmem (!%p166_p13), [#allocation3], %s384_s27 }
  0x31   : > { %509 = dma.done.wait (%p603_p7), %s172_s28, 128  }
  0x32   : > { %511 = vsyncadd (%p603_p7), %s172_s28, 4294967168  ;;  %v209_v0 = vlaneseq  ;;  %vm205_vm0 = vcmask 7168   ;;  %v537_v1 = vmov -3.4028235e+38   ;;  %v207_v3 = vld [vmem:[%s175_s29] sm:$0xff]  ;;  %v538_v5 = vmov 0.0  }
  0x33   : > { %206 = vst.msk [vmem:[#allocation2] sm:$0xff] %vm205_vm0, %v537_v1  ;;  %391 = vmatprep.subr.mxu0 %v538_v5  ;;  %vm539_vm2 = vmmov 0   ;;  %v225_v9 = vld [vmem:[%s695_s1] sm:$0xff]  ;;  %vm227_vm3 = vcmask 64512   ;;  %p197_p7 = scmp.lt.s32.totalorder %s526_s15, 1 }
  0x34   : > { %v210_v2 = vand.u32 127, %v209_v0  ;;  %393 = vmatprep.mubr.msk.f32.mxu0 %vm539_vm2, %v538_v5  ;;  %v224_v11 = vld [vmem:[%s696_s2] sm:$0xff] }
  0x35   : > { %s711_s15 = smov (!%p197_p7, %s526_s15), 1 }
  0x36   : > { %vm213_vm1 = vcmp.lt.s32.totalorder %v210_v2, 16  ;;  %s385_s4 = sshll.u32 %s711_s15, 3 }
  0x37   : > { %v214_v4 = vsel %vm213_vm1, %v207_v3, -3.4028235e+38  ;;  %s200_s9 = scalar_lea.vmem %s697_s3, %s385_s4 }
  0x38   : > { %216 = vmax.xlane.f32.xlu0 %v214_v4 }
  0x3a   : > { %v215_v6 = vld [vmem:[#allocation2] sm:$0xff] }
  0xc5   : > { %v217_v7 = vpop.xlane.xlu0 %216 }
  0xc6   : > { %v218_v8 = vmax.f32 %v215_v6, %v217_v7 }
  0xc8   : > { %220 = vst.msk [vmem:[#allocation2] sm:$0xff] %vm205_vm0, %v218_v8 }
  0xcf   : > { %v226_v10 = vld [vmem:[#allocation2] sm:$0xff] }
  0xd0   : > { %392 = vmatpush3.msra.mxu0 %v226_v10 }
  0xd1   : > { %394 = vmatmul.mubr.msk.f32.vlgmr.msra.gmra.mrb[0].mxu0 %vm227_vm3, %v225_v9 }
 0x1a4   : > { %v297_v12 = vpop.f32.mrb[0].mxu0 }
 0x1a5   : > { %v301_v13 = vsub.f32 %v224_v11, %v297_v12  ;;  %v395_v14 = vpop.f32.mrb[1].mxu0 }
 0x1a7   : > { %302 = vst.msk [vmem:[%s200_s9] sm:$0xff] %vm205_vm0, %v301_v13 }
 0x1a8 PF: > { %s16_s17 = sadd.s32 1, %s534_s17   ;;  %s703_s12 = smov %s518_s13 }
 0x1a9   : > { %p13_p9 = scmp.ge.s32.totalorder %s16_s17, 4   ;;  %s704_s13 = smov %s522_s14 }
 0x1aa   : > { %s705_s14 = smov %s609_s24  ;;  %s706_s15 = smov %s530_s16 }
 0x1ab   : > { %s707_s16 = smov %s709_s19  ;;  %15 = sbr.rel (!%p13_p9) target bundleno = 4 (0x4), region = 80 }
 0x1b2   :  { %322 = vsyncpa [#allocation4], 1 }
 0x1b3   :  { %324 = vsyncpa [#allocation4 + $0x1], 1 }

</bundles_post_ra>
